<compile_context>
chip_gen: v6e
topology: v6e:2x2x1
jax: 0.10.0
libtpu: 0.0.40
codegen_flags: <defaults>
</compile_context>

<pallas_src>
import math

import jax
import jax.numpy as jnp
from jax.experimental import pallas as pl
from jax.experimental.pallas import tpu as pltpu

BN_EPS = 1e-5

# Rows of the coalesced (8,128) f32 parameter block.
_ROW_G1, _ROW_BT1, _ROW_G2, _ROW_BT2, _ROW_B3 = 0, 1, 2, 3, 4


def _round_up(n, m):
    return ((n + m - 1) // m) * m


def _bn_relu(h, gamma, beta):
    """Training-mode BatchNorm1d (batch mean, biased batch var) + ReLU, one-pass stats."""
    m = jnp.mean(h, axis=0, keepdims=True)                       # [1, N]
    ms = jnp.mean(h * h, axis=0, keepdims=True)                  # [1, N]
    var = jnp.maximum(ms - m * m, 0.0)                           # clamp f32 cancellation
    scale = jax.lax.rsqrt(var + BN_EPS) * gamma                  # folded scale
    shift = beta - m * scale                                     # folded shift
    return jnp.maximum(h * scale + shift, 0.0)                   # one [B,N] mul + add


def mnist_net_kernel(x_ref, w1_ref, w2_ref, w3_ref, p_ref, out_ref):
    # fc1 -> bn1 -> relu  (fc1/fc2 biases are mathematically cancelled by training-mode BN,
    # so they are not passed to the kernel at all)
    x = x_ref[...].astype(jnp.bfloat16)                                      # [B, 784]
    h1 = jnp.dot(x, w1_ref[...], preferred_element_type=jnp.float32)        # [B, 128] f32
    h1 = _bn_relu(h1, p_ref[_ROW_G1:_ROW_G1 + 1, :], p_ref[_ROW_BT1:_ROW_BT1 + 1, :])

    # fc2 -> bn2 -> relu
    h2 = jnp.dot(h1.astype(jnp.bfloat16), w2_ref[...],
                 preferred_element_type=jnp.float32)                         # [B, 64] f32
    h2 = _bn_relu(h2, p_ref[_ROW_G2:_ROW_G2 + 1, 0:64], p_ref[_ROW_BT2:_ROW_BT2 + 1, 0:64])

    # fc3 into a lane-dense (128-wide) padded output block; padded cols are exactly zero.
    out = (jnp.dot(h2.astype(jnp.bfloat16), w3_ref[...],
                   preferred_element_type=jnp.float32)
           + p_ref[_ROW_B3:_ROW_B3 + 1, :])                                  # [B, 128]
    out_ref[...] = out.astype(out_ref.dtype)


def mnist_net_forward(x_nchw, params):
    """Returns lane-dense padded logits [B, 128]; columns >= out_features are exactly 0.

    Slice (or fuse) `[:, :params['out_features']]` in the consumer — kept out of this
    function so the standalone slice op isn't launched on every call.
    """
    B = x_nchw.shape[0]
    x_flat = x_nchw.reshape(B, -1).astype(jnp.float32)      # x.view(x.size(0), -1)

    n_pad = params["w3"].shape[1]                            # padded lane-dense out dim
    in_features = params["w1"].shape[0]
    assert x_flat.shape[1] == in_features

    args = (x_flat, params["w1"], params["w2"], params["w3"], params["pblock"])

    flops = 2 * B * (in_features * 128 + 128 * 64 + 64 * n_pad)
    bytes_accessed = sum(int(a.size) * a.dtype.itemsize for a in args) + B * n_pad * 4
    cost = pl.CostEstimate(flops=flops, transcendentals=128 + 64,
                           bytes_accessed=bytes_accessed)

    vmem_spec = pl.BlockSpec(memory_space=pltpu.MemorySpace.VMEM)
    out_pad = pl.pallas_call(
        mnist_net_kernel,
        out_shape=jax.ShapeDtypeStruct((B, n_pad), jnp.float32),
        in_specs=[vmem_spec] * len(args),
        out_specs=vmem_spec,
        cost_estimate=cost,
    )(*args)

    return out_pad


def init_params(key, in_features, out_features):
    """Synthetic init matching MNISTNet's parameter shapes, stored in kernel layout.

    Linear weights are pre-transposed to [in, out] and cast to bf16 (w1 is *unpadded*);
    w3 columns are zero-padded to a 128-wide lane-dense output block. fc1/fc2 biases are
    omitted (cancelled by training-mode BatchNorm). All 1-D params (g1, bt1, g2, bt2, b3)
    live in one coalesced (8,128) f32 block.
    """
    n_pad = max(_round_up(out_features, 128), 128)

    ks = jax.random.split(key, 6)

    def linear(kw, kb, fan_in, fan_out):
        bound = 1.0 / math.sqrt(fan_in)
        w = jax.random.uniform(kw, (fan_in, fan_out), jnp.float32, -bound, bound)
        b = jax.random.uniform(kb, (fan_out,), jnp.float32, -bound, bound)
        return w, b

    w1, _b1 = linear(ks[0], ks[1], in_features, 128)   # bias dead under training-mode BN
    w2, _b2 = linear(ks[2], ks[3], 128, 64)            # bias dead under training-mode BN
    w3, b3 = linear(ks[4], ks[5], 64, out_features)

    w1 = w1.astype(jnp.bfloat16)                                         # [784, 128]
    w2 = w2.astype(jnp.bfloat16)                                         # [128, 64]
    w3 = jnp.pad(w3, ((0, 0), (0, n_pad - out_features))).astype(jnp.bfloat16)  # [64, 128]

    # Coalesced parameter block: rows = [g1, bt1, g2, bt2, b3, 0, 0, 0], all padded to 128.
    pblock = jnp.zeros((8, 128), jnp.float32)
    pblock = pblock.at[_ROW_G1, :128].set(jnp.ones((128,), jnp.float32))   # bn1 gamma
    pblock = pblock.at[_ROW_BT1, :128].set(jnp.zeros((128,), jnp.float32)) # bn1 beta
    pblock = pblock.at[_ROW_G2, :64].set(jnp.ones((64,), jnp.float32))     # bn2 gamma
    pblock = pblock.at[_ROW_BT2, :64].set(jnp.zeros((64,), jnp.float32))   # bn2 beta
    pblock = pblock.at[_ROW_B3, :out_features].set(b3)                      # fc3 bias

    return {
        "w1": w1, "w2": w2, "w3": w3,
        "pblock": pblock,
        "out_features": out_features,
    }


if __name__ == "__main__":
    # MNIST-like but small: batch=8, single-channel 28x28 images -> in_features=784, 10 classes.
    B, C, H, W = 8, 1, 28, 28
    in_features = C * H * W
    out_features = 10

    key = jax.random.PRNGKey(0)
    kx, kp = jax.random.split(key)
    x = jax.random.normal(kx, (B, C, H, W), jnp.float32)
    params = init_params(kp, in_features, out_features)

    out_pad = mnist_net_forward(x, params)          # [B, 128] lane-dense padded logits
    jax.block_until_ready(out_pad)

    logits = out_pad[:, :out_features]              # consumer-side slice (deferred)
    assert logits.shape == (B, out_features)
    assert bool(jnp.all(jnp.isfinite(logits)))
    # Padded logit columns must be exactly zero (zero weight cols + zero bias).
    assert bool(jnp.all(out_pad[:, out_features:] == 0.0))
    print("KERNEL_OK")
</pallas_src>

<mosaic_0001>
module attributes {stable_mosaic.version = 11 : i64} {
  func.func @mnist_net_kernel(%arg0: memref<8x784xf32, #tpu.memory_space<vmem>>, %arg1: memref<784x128xbf16, #tpu.memory_space<vmem>>, %arg2: memref<128x64xbf16, #tpu.memory_space<vmem>>, %arg3: memref<64x128xbf16, #tpu.memory_space<vmem>>, %arg4: memref<8x128xf32, #tpu.memory_space<vmem>>, %arg5: memref<8x128xf32, #tpu.memory_space<vmem>>) attributes {dimension_semantics = [], scalar_prefetch = 0 : i64, scratch_operands = 0 : i64, tpu.core_type = #tpu.core_type<tc>} {
    %c0 = arith.constant 0 : index
    %c0_0 = arith.constant 0 : index
    %0 = vector.load %arg0[%c0, %c0_0] : memref<8x784xf32, #tpu.memory_space<vmem>>, vector<8x784xf32>
    %1 = arith.truncf %0 : vector<8x784xf32> to vector<8x784xbf16>
    %c0_1 = arith.constant 0 : index
    %c0_2 = arith.constant 0 : index
    %2 = vector.load %arg1[%c0_1, %c0_2] : memref<784x128xbf16, #tpu.memory_space<vmem>>, vector<784x128xbf16>
    %cst = arith.constant dense<0.000000e+00> : vector<8x128xf32>
    %3 = tpu.matmul %1, %2, %cst {dimension_numbers = #tpu.dot_dimension_numbers<[1], [0], [0], [1], [0, 0, 1, 1], [], []>} : vector<8x784xbf16>, vector<784x128xbf16>, vector<8x128xf32> -> vector<8x128xf32>
    %c0_3 = arith.constant 0 : index
    %c0_4 = arith.constant 0 : index
    %4 = vector.load %arg4[%c0_3, %c0_4] : memref<8x128xf32, #tpu.memory_space<vmem>>, vector<1x128xf32>
    %c1 = arith.constant 1 : index
    %c0_5 = arith.constant 0 : index
    %5 = vector.load %arg4[%c1, %c0_5] : memref<8x128xf32, #tpu.memory_space<vmem>>, vector<1x128xf32>
    %cst_6 = arith.constant dense<0.000000e+00> : vector<128xf32>
    %6 = vector.multi_reduction <add>, %3, %cst_6 [0] : vector<8x128xf32> to vector<128xf32>
    %7 = vector.shape_cast %6 : vector<128xf32> to vector<1x128xf32>
    %cst_7 = arith.constant 8.000000e+00 : f32
    %8 = vector.broadcast %cst_7 : f32 to vector<1x128xf32>
    %9 = arith.divf %7, %8 : vector<1x128xf32>
    %10 = arith.mulf %3, %3 : vector<8x128xf32>
    %cst_8 = arith.constant dense<0.000000e+00> : vector<128xf32>
    %11 = vector.multi_reduction <add>, %10, %cst_8 [0] : vector<8x128xf32> to vector<128xf32>
    %12 = vector.shape_cast %11 : vector<128xf32> to vector<1x128xf32>
    %cst_9 = arith.constant 8.000000e+00 : f32
    %13 = vector.broadcast %cst_9 : f32 to vector<1x128xf32>
    %14 = arith.divf %12, %13 : vector<1x128xf32>
    %15 = arith.mulf %9, %9 : vector<1x128xf32>
    %16 = arith.subf %14, %15 : vector<1x128xf32>
    %cst_10 = arith.constant 0.000000e+00 : f32
    %17 = vector.broadcast %cst_10 : f32 to vector<1x128xf32>
    %18 = arith.maximumf %16, %17 : vector<1x128xf32>
    %cst_11 = arith.constant 9.99999974E-6 : f32
    %19 = vector.broadcast %cst_11 : f32 to vector<1x128xf32>
    %20 = arith.addf %18, %19 : vector<1x128xf32>
    %21 = math.rsqrt %20 : vector<1x128xf32>
    %22 = arith.mulf %21, %4 : vector<1x128xf32>
    %23 = arith.mulf %9, %22 : vector<1x128xf32>
    %24 = arith.subf %5, %23 : vector<1x128xf32>
    %25 = vector.broadcast %22 : vector<1x128xf32> to vector<8x128xf32>
    %26 = arith.mulf %3, %25 : vector<8x128xf32>
    %27 = vector.broadcast %24 : vector<1x128xf32> to vector<8x128xf32>
    %28 = arith.addf %26, %27 : vector<8x128xf32>
    %cst_12 = arith.constant 0.000000e+00 : f32
    %29 = vector.broadcast %cst_12 : f32 to vector<8x128xf32>
    %30 = arith.maximumf %28, %29 : vector<8x128xf32>
    %31 = arith.truncf %30 : vector<8x128xf32> to vector<8x128xbf16>
    %c0_13 = arith.constant 0 : index
    %c0_14 = arith.constant 0 : index
    %32 = vector.load %arg2[%c0_13, %c0_14] : memref<128x64xbf16, #tpu.memory_space<vmem>>, vector<128x64xbf16>
    %cst_15 = arith.constant dense<0.000000e+00> : vector<8x64xf32>
    %33 = tpu.matmul %31, %32, %cst_15 {dimension_numbers = #tpu.dot_dimension_numbers<[1], [0], [0], [1], [0, 0, 1, 1], [], []>} : vector<8x128xbf16>, vector<128x64xbf16>, vector<8x64xf32> -> vector<8x64xf32>
    %c2 = arith.constant 2 : index
    %c0_16 = arith.constant 0 : index
    %34 = vector.load %arg4[%c2, %c0_16] : memref<8x128xf32, #tpu.memory_space<vmem>>, vector<1x64xf32>
    %c3 = arith.constant 3 : index
    %c0_17 = arith.constant 0 : index
    %35 = vector.load %arg4[%c3, %c0_17] : memref<8x128xf32, #tpu.memory_space<vmem>>, vector<1x64xf32>
    %cst_18 = arith.constant dense<0.000000e+00> : vector<64xf32>
    %36 = vector.multi_reduction <add>, %33, %cst_18 [0] : vector<8x64xf32> to vector<64xf32>
    %37 = vector.shape_cast %36 : vector<64xf32> to vector<1x64xf32>
    %cst_19 = arith.constant 8.000000e+00 : f32
    %38 = vector.broadcast %cst_19 : f32 to vector<1x64xf32>
    %39 = arith.divf %37, %38 : vector<1x64xf32>
    %40 = arith.mulf %33, %33 : vector<8x64xf32>
    %cst_20 = arith.constant dense<0.000000e+00> : vector<64xf32>
    %41 = vector.multi_reduction <add>, %40, %cst_20 [0] : vector<8x64xf32> to vector<64xf32>
    %42 = vector.shape_cast %41 : vector<64xf32> to vector<1x64xf32>
    %cst_21 = arith.constant 8.000000e+00 : f32
    %43 = vector.broadcast %cst_21 : f32 to vector<1x64xf32>
    %44 = arith.divf %42, %43 : vector<1x64xf32>
    %45 = arith.mulf %39, %39 : vector<1x64xf32>
    %46 = arith.subf %44, %45 : vector<1x64xf32>
    %cst_22 = arith.constant 0.000000e+00 : f32
    %47 = vector.broadcast %cst_22 : f32 to vector<1x64xf32>
    %48 = arith.maximumf %46, %47 : vector<1x64xf32>
    %cst_23 = arith.constant 9.99999974E-6 : f32
    %49 = vector.broadcast %cst_23 : f32 to vector<1x64xf32>
    %50 = arith.addf %48, %49 : vector<1x64xf32>
    %51 = math.rsqrt %50 : vector<1x64xf32>
    %52 = arith.mulf %51, %34 : vector<1x64xf32>
    %53 = arith.mulf %39, %52 : vector<1x64xf32>
    %54 = arith.subf %35, %53 : vector<1x64xf32>
    %55 = vector.broadcast %52 : vector<1x64xf32> to vector<8x64xf32>
    %56 = arith.mulf %33, %55 : vector<8x64xf32>
    %57 = vector.broadcast %54 : vector<1x64xf32> to vector<8x64xf32>
    %58 = arith.addf %56, %57 : vector<8x64xf32>
    %cst_24 = arith.constant 0.000000e+00 : f32
    %59 = vector.broadcast %cst_24 : f32 to vector<8x64xf32>
    %60 = arith.maximumf %58, %59 : vector<8x64xf32>
    %61 = arith.truncf %60 : vector<8x64xf32> to vector<8x64xbf16>
    %c0_25 = arith.constant 0 : index
    %c0_26 = arith.constant 0 : index
    %62 = vector.load %arg3[%c0_25, %c0_26] : memref<64x128xbf16, #tpu.memory_space<vmem>>, vector<64x128xbf16>
    %cst_27 = arith.constant dense<0.000000e+00> : vector<8x128xf32>
    %63 = tpu.matmul %61, %62, %cst_27 {dimension_numbers = #tpu.dot_dimension_numbers<[1], [0], [0], [1], [0, 0, 1, 1], [], []>} : vector<8x64xbf16>, vector<64x128xbf16>, vector<8x128xf32> -> vector<8x128xf32>
    %c4 = arith.constant 4 : index
    %c0_28 = arith.constant 0 : index
    %64 = vector.load %arg4[%c4, %c0_28] : memref<8x128xf32, #tpu.memory_space<vmem>>, vector<1x128xf32>
    %65 = vector.broadcast %64 : vector<1x128xf32> to vector<8x128xf32>
    %66 = arith.addf %63, %65 : vector<8x128xf32>
    %c0_29 = arith.constant 0 : index
    %c0_30 = arith.constant 0 : index
    %67 = vector.load %arg5[%c0_29, %c0_30] : memref<8x128xf32, #tpu.memory_space<vmem>>, vector<8x128xf32>
    tpu.vector_store %arg5[%c0_29, %c0_30], %66 {strides = array<i32>} : memref<8x128xf32, #tpu.memory_space<vmem>>, vector<8x128xf32>,
    return
  }
}

</mosaic_0001>

<bundles_post_ra>
// kernel: tpu_custom_call.1
= control target key start
LH: loop header
LB: loop body
LE: loop exit
PB: predicated region body
PF: predicated region fallthrough
CT: control target
= control target key end

     0   :  { %10 = vsyncpa [#allocation3], 0  ;;  %s1319_s0 = inlined_call_operand.vmem [shape: f32[8,784], index: 0, kind: input, shape index: {}]   ;;  %s1320_s1 = inlined_call_operand.hbm [shape: bf16[784,128], index: 1, kind: input, shape index: {}]   ;;  %s1321_s2 = inlined_call_operand.vmem [shape: bf16[128,64], index: 2, kind: input, shape index: {}]   ;;  %s1322_s3 = inlined_call_operand.vmem [shape: bf16[64,128], index: 3, kind: input, shape index: {}]   ;;  %s1323_s4 = inlined_call_operand.vmem [shape: f32[8,128], index: 4, kind: input, shape index: {}]   ;;  %s1324_s5 = inlined_call_operand.hbm [shape: f32[8,128], index: 5, kind: output, shape index: {}]  }
   0x1   :  { %11 = vsyncpa [#allocation4], 0  ;;  %s1183_s18 = smov [#allocation2]  }
   0x2   :  { %s19_s19 = sshll.u32 %s1183_s18, 4  ;;  %s20_s19 = int_to_ptr.vmem [resolvable:$true] %s19_s19 }
   0x3   :  { %s1147_s20 = scalar_lea.vmem %s20_s19, 6272  ;;  %p1152_p1 = scmp.lt.s32.totalorder %s20_s19, %s20_s19 }
   0x4   :  { %p1148_p0 = scmp.ne.s32.totalorder %s20_s19, %s1147_s20  ;;  %p1153_p2 = scmp.lt.s32.totalorder %s1147_s20, %s1147_s20 }
   0x6   :  { %p1154_p3 = por %p1153_p2, %p1152_p1 }
   0x8   :  { %p1155_p4 = pnand %p1154_p3, %p1148_p0 }
   0xa   :  { %1158 = shalt.err (!%p1155_p4)
}
   0xb   :  { %s1184_s21 = smov 64   ;;  %s1185_s22 = smov 4  }
   0xc   :  { %25 = dma.hbm_to_vmem [thread:$0]  %s1320_s1, 6272, %s20_s19, [#allocation3], %s1184_s21, %s1184_s21, %s1185_s22  }
   0xd   :  { %1179 = dma.done.wait [#allocation3], 6272  }
   0xe   :  { %1180 = vsyncadd [#allocation3], 4294961024  ;;  %v1074_v0 = vld [vmem:[#allocation2 + $0x78] sm:$0xff]   ;;  %v1078_v4 = vld [vmem:[#allocation2 + $0x70] sm:$0xff]   ;;  %v1186_v41 = vmov 0.0   ;;  %vm1187_vm0 = vmmov 0  }
   0xf   :  { %v1075_v1 = vld [vmem:[#allocation2 + $0xf8] sm:$0xff]   ;;  %948 = vmatprep.subr.bf16.mxu0 %v1074_v0  ;;  %v1079_v5 = vld [vmem:[#allocation2 + $0xf0] sm:$0xff]   ;;  %v1082_v8 = vld [vmem:[#allocation2 + $0x68] sm:$0xff]   ;;  %vm442_vm1 = vcmask 130048   ;;  %vm750_vm2 = vcmask 523264   ;;  %s1188_s17 = smov [#allocation5]  }
  0x10   :  { %v1076_v2 = vld [vmem:[#allocation2 + $0x38] sm:$0xff]   ;;  %970 = vmatprep.subr.bf16.mxu1 %v1075_v1  ;;  %v1080_v6 = vld [vmem:[#allocation2 + $0x30] sm:$0xff]   ;;  %v1083_v9 = vld [vmem:[#allocation2 + $0xe8] sm:$0xff]   ;;  %s875_s18 = sshll.u32 %s1188_s17, 4  ;;  %s876_s18 = int_to_ptr.vmem [resolvable:$true] %s875_s18 }
  0x11   :  { %v1077_v3 = vld [vmem:[#allocation2 + $0xb8] sm:$0xff]   ;;  %949 = vmatpush3.bf16.msra.mxu0 %v1076_v2  ;;  %v1081_v7 = vld [vmem:[#allocation2 + $0xb0] sm:$0xff]   ;;  %v1084_v10 = vld [vmem:[#allocation2 + $0x28] sm:$0xff]   ;;  %s1159_s19 = scalar_lea.vmem %s876_s18, 128  ;;  %p1164_p6 = scmp.lt.s32.totalorder %s876_s18, %s876_s18 }
  0x12   :  { %971 = vmatpush3.bf16.msra.mxu1 %v1077_v3  ;;  %950 = vmatprep.subr.bf16.mxu0 %v1078_v4  ;;  %v1085_v11 = vld [vmem:[#allocation2 + $0xa8] sm:$0xff]   ;;  %v1086_v12 = vld [vmem:[#allocation2 + $0x60] sm:$0xff]   ;;  %v1090_v16 = vld [vmem:[#allocation2 + $0x58] sm:$0xff]   ;;  %p1160_p5 = scmp.ne.s32.totalorder %s876_s18, %s1159_s19  ;;  %p1165_p7 = scmp.lt.s32.totalorder %s1159_s19, %s1159_s19 }
  0x13   :  { %972 = vmatprep.subr.bf16.mxu1 %v1079_v5  ;;  %v1087_v13 = vld [vmem:[#allocation2 + $0xe0] sm:$0xff]   ;;  %v1091_v17 = vld [vmem:[#allocation2 + $0xd8] sm:$0xff]   ;;  %v1094_v20 = vld [vmem:[#allocation2 + $0x50] sm:$0xff]  }
  0x14   :  { %v1088_v14 = vld [vmem:[#allocation2 + $0x20] sm:$0xff]   ;;  %v1092_v18 = vld [vmem:[#allocation2 + $0x18] sm:$0xff]   ;;  %v1095_v21 = vld [vmem:[#allocation2 + $0xd0] sm:$0xff]   ;;  %p1166_p8 = por %p1165_p7, %p1164_p6 }
  0x15   :  { %951 = vmatpush3.bf16.msra.mxu0 %v1080_v6  ;;  %v1089_v15 = vld [vmem:[#allocation2 + $0xa0] sm:$0xff]   ;;  %v1093_v19 = vld [vmem:[#allocation2 + $0x98] sm:$0xff]   ;;  %v1096_v22 = vld [vmem:[#allocation2 + $0x10] sm:$0xff]  }
  0x16   :  { %973 = vmatpush3.bf16.msra.mxu1 %v1081_v7  ;;  %952 = vmatprep.subr.bf16.mxu0 %v1082_v8  ;;  %v1097_v23 = vld [vmem:[#allocation2 + $0x90] sm:$0xff]   ;;  %v1098_v24 = vld [vmem:[#allocation2 + $0x48] sm:$0xff]   ;;  %v1102_v28 = vld [vmem:[#allocation2 + $0x40] sm:$0xff]   ;;  %p1167_p9 = pnand %p1166_p8, %p1160_p5 }
  0x17   :  { %974 = vmatprep.subr.bf16.mxu1 %v1083_v9  ;;  %v1099_v25 = vld [vmem:[#allocation2 + $0xc8] sm:$0xff]   ;;  %v1103_v29 = vld [vmem:[#allocation2 + $0xc0] sm:$0xff]   ;;  %v39_v33 = vld [vmem:[%s1319_s0 + $0x18] sm:$0xff] }
  0x18   :  { %v1100_v26 = vld [vmem:[#allocation2 + $0x8] sm:$0xff]   ;;  %v1104_v30 = vld [vmem:[#allocation2] sm:$0xff]   ;;  %v46_v36 = vpack.c.bf16 %v39_v33, %v39_v33  ;;  %v38_v38 = vld [vmem:[%s1319_s0 + $0x10] sm:$0xff] }
  0x19   :  { %953 = vmatpush3.bf16.msra.mxu0 %v1084_v10  ;;  %v1101_v27 = vld [vmem:[#allocation2 + $0x88] sm:$0xff]   ;;  %v1105_v31 = vld [vmem:[#allocation2 + $0x80] sm:$0xff]   ;;  %v45_v39 = vpack.c.bf16 %v38_v38, %v38_v38  ;;  %v1106_v40 = vld [vmem:[#allocation2 + $0x178] sm:$0xff]  }
  0x1a   :  { %975 = vmatpush3.bf16.msra.mxu1 %v1085_v11  ;;  %954 = vmatprep.subr.bf16.mxu0 %v1086_v12  ;;  %v37_v32 = vld [vmem:[%s1319_s0 + $0x8] sm:$0xff]  ;;  %v36_v34 = vld [vmem:[%s1319_s0] sm:$0xff]  ;;  %v1107_v42 = vld [vmem:[#allocation2 + $0x138] sm:$0xff]  }
  0x1b   :  { %976 = vmatprep.subr.bf16.mxu1 %v1087_v13  ;;  %v44_v35 = vpack.c.bf16 %v37_v32, %v37_v32  ;;  %v43_v37 = vpack.c.bf16 %v36_v34, %v36_v34  ;;  %518 = vmatprep.mubr.bf16.mxu1 %v46_v36  ;;  %v1108_v43 = vld [vmem:[#allocation2 + $0x170] sm:$0xff]   ;;  %v1110_v45 = vld [vmem:[#allocation2 + $0x168] sm:$0xff]   ;;  %v1112_v47 = vld [vmem:[#allocation2 + $0x160] sm:$0xff]  }
  0x1c   :  { %v1109_v44 = vld [vmem:[#allocation2 + $0x130] sm:$0xff]   ;;  %v1111_v46 = vld [vmem:[#allocation2 + $0x128] sm:$0xff]   ;;  %v1113_v48 = vld [vmem:[#allocation2 + $0x120] sm:$0xff]  }
  0x1d   :  { %955 = vmatpush3.bf16.msra.mxu0 %v1088_v14  ;;  %478 = vmatprep.mubr.bf16.mxu0 %v44_v35  ;;  %v1114_v49 = vld [vmem:[#allocation2 + $0x158] sm:$0xff]   ;;  %v1116_v51 = vld [vmem:[#allocation2 + $0x150] sm:$0xff]   ;;  %v1122_v52 = vld [vmem:[#allocation2 + $0x180] sm:$0xff]  }
  0x1e   :  { %977 = vmatpush3.bf16.msra.mxu1 %v1089_v15  ;;  %956 = vmatprep.subr.bf16.mxu0 %v1090_v16  ;;  %v1115_v50 = vld [vmem:[#allocation2 + $0x118] sm:$0xff]   ;;  %v41_v53 = vld [vmem:[%s1319_s0 + $0x28] sm:$0xff]  ;;  %v42_v55 = vld [vmem:[%s1319_s0 + $0x30] sm:$0xff] }
  0x1f   :  { %978 = vmatprep.subr.bf16.mxu1 %v1091_v17  ;;  %v48_v54 = vpack.c.bf16 %v41_v53, %v41_v53  ;;  %v1117_v56 = vld [vmem:[#allocation2 + $0x110] sm:$0xff]   ;;  %v49_v57 = vpack.c.bf16 %v42_v55, %v42_v55  ;;  %v1118_v58 = vld [vmem:[#allocation2 + $0x148] sm:$0xff]   ;;  %v1120_v60 = vld [vmem:[#allocation2 + $0x140] sm:$0xff]  }
  0x20   :  { %v1119_v59 = vld [vmem:[#allocation2 + $0x108] sm:$0xff]   ;;  %v1121_v61 = vld [vmem:[#allocation2 + $0x100] sm:$0xff]   ;;  %v1123_v0 = vld [vmem:[%s1321_s2 + $0x38] sm:$0xff]  }
  0x21   :  { %957 = vmatpush3.bf16.msra.mxu0 %v1092_v18  ;;  %v40_v62 = vld [vmem:[%s1319_s0 + $0x20] sm:$0xff]  ;;  %v1124_v1 = vld [vmem:[%s1321_s2 + $0x30] sm:$0xff]   ;;  %v1125_v2 = vld [vmem:[%s1321_s2 + $0x28] sm:$0xff]  }
  0x22   :  { %979 = vmatpush3.bf16.msra.mxu1 %v1093_v19  ;;  %958 = vmatprep.subr.bf16.mxu0 %v1094_v20  ;;  %v47_v63 = vpack.c.bf16 %v40_v62, %v40_v62  ;;  %v1126_v3 = vld [vmem:[%s1321_s2 + $0x20] sm:$0xff]   ;;  %v1127_v4 = vld [vmem:[%s1321_s2 + $0x18] sm:$0xff]   ;;  %v1128_v5 = vld [vmem:[%s1321_s2 + $0x10] sm:$0xff]  }
  0x23   :  { %980 = vmatprep.subr.bf16.mxu1 %v1095_v21  ;;  %v1129_v6 = vld [vmem:[%s1321_s2 + $0x8] sm:$0xff]   ;;  %v1130_v7 = vld [vmem:[%s1321_s2] sm:$0xff]  }
  0x25   :  { %959 = vmatpush3.bf16.msra.mxu0 %v1096_v22 }
  0x26   :  { %981 = vmatpush3.bf16.msra.mxu1 %v1097_v23  ;;  %960 = vmatprep.subr.bf16.mxu0 %v1098_v24 }
  0x27   :  { %982 = vmatprep.subr.bf16.mxu1 %v1099_v25 }
  0x29   :  { %961 = vmatpush3.bf16.msra.mxu0 %v1100_v26 }
  0x2a   :  { %983 = vmatpush3.bf16.msra.mxu1 %v1101_v27  ;;  %962 = vmatprep.subr.bf16.mxu0 %v1102_v28 }
  0x2b   :  { %984 = vmatprep.subr.bf16.mxu1 %v1103_v29 }
  0x2d   :  { %963 = vmatpush3.bf16.msra.mxu0 %v1104_v30 }
  0x2e   :  { %985 = vmatpush3.bf16.msra.mxu1 %v1105_v31  ;;  %992 = vmatprep.subr.bf16.mxu0 %v1106_v40 }
  0x2f   :  { %1030 = vmatprep.subr.bf16.mxu1 %v1186_v41 }
  0x30   :  { %479 = vmatmul.mubr.bf16.vlgmr.msra.gmra.mxu0 %v43_v37 }
  0x31   :  { %519 = vmatmul.mubr.bf16.vlgmr.msra.gmra.mxu1 %v45_v39  ;;  %993 = vmatpush3.bf16.msra.mxu0 %v1107_v42 }
  0x32   :  { %1032 = vmatprep.mubr.msk.bf16.mxu1 %vm1187_vm0, %v1186_v41  ;;  %994 = vmatprep.subr.bf16.mxu0 %v1108_v43 }
  0x33   :  { %1031 = vmatpush3.bf16.msra.mxu1 %v1122_v52  ;;  %558 = vmatprep.mubr.bf16.mxu0 %v48_v54  ;;  %v606_v52 = vld [vmem:[%s1323_s4] sm:$0x1] }
  0x34   :  { %1036 = vmatprep.subr.bf16.mxu1 %v1186_v41 }
  0x35   :  { %995 = vmatpush3.bf16.msra.mxu0 %v1109_v44 }
  0x36   :  { %996 = vmatprep.subr.bf16.mxu0 %v1110_v45 }
  0x39   :  { %997 = vmatpush3.bf16.msra.mxu0 %v1111_v46  ;;  %1033 = vmatmul.mubr.msk.bf16.vlgmr.msra.gmra.mxu1 %vm442_vm1, %v49_v57 }
  0x3a   :  { %998 = vmatprep.subr.bf16.mxu0 %v1112_v47  ;;  %1052 = vmatprep.mubr.msk.bf16.mxu1 %vm1187_vm0, %v1186_v41 }
  0x3b   :  { %1037 = vmatpush3.bf16.msra.mxu1 %v1123_v0 }
  0x3c   :  { %1038 = vmatprep.subr.bf16.mxu1 %v1186_v41 }
  0x3d   :  { %999 = vmatpush3.bf16.msra.mxu0 %v1113_v48 }
  0x3e   :  { %1000 = vmatprep.subr.bf16.mxu0 %v1114_v49 }
  0x3f   :  { %1039 = vmatpush3.bf16.msra.mxu1 %v1124_v1  ;;  %v1131_v1 = vld [vmem:[%s1322_s3 + $0x18] sm:$0xff]  }
  0x40   :  { %1040 = vmatprep.subr.bf16.mxu1 %v1186_v41 }
  0x41   :  { %1001 = vmatpush3.bf16.msra.mxu0 %v1115_v50  ;;  %v632_v50 = vlaneseq }
  0x42   :  { %1002 = vmatprep.subr.bf16.mxu0 %v1116_v51 }
  0x43   :  { %1041 = vmatpush3.bf16.msra.mxu1 %v1125_v2  ;;  %v633_v51 = vshrl.u32 %v632_v50, 7  ;;  %v1132_v2 = vld [vmem:[%s1322_s3 + $0x10] sm:$0xff]  }
  0x44   :  { %1042 = vmatprep.subr.bf16.mxu1 %v1186_v41 }
  0x45   :  { %1003 = vmatpush3.bf16.msra.mxu0 %v1117_v56  ;;  %v634_v53 = vsub.s32 0, %v633_v51  ;;  %v607_v56 = vld [vmem:[%s1323_s4 + $0x1] sm:$0x1] }
  0x46   :  { %1004 = vmatprep.subr.bf16.mxu0 %v1118_v58 }
  0x47   :  { %1043 = vmatpush3.bf16.msra.mxu1 %v1126_v3  ;;  %v1133_v3 = vld [vmem:[%s1322_s3 + $0x8] sm:$0xff]  }
  0x48   :  { %1044 = vmatprep.subr.bf16.mxu1 %v1186_v41 }
  0x49   :  { %1005 = vmatpush3.bf16.msra.mxu0 %v1119_v59 }
  0x4a   :  { %1006 = vmatprep.subr.bf16.mxu0 %v1120_v60 }
  0x4b   :  { %1045 = vmatpush3.bf16.msra.mxu1 %v1127_v4  ;;  %v1134_v4 = vld [vmem:[%s1322_s3] sm:$0xff]  }
  0x4c   :  { %1046 = vmatprep.subr.bf16.mxu1 %v1186_v41 }
  0x4d   :  { %1007 = vmatpush3.bf16.msra.mxu0 %v1121_v61 }
  0x4e   :  { %1056 = vmatprep.subr.bf16.mxu0 %v1186_v41 }
  0x4f   :  { %1047 = vmatpush3.bf16.msra.mxu1 %v1128_v5 }
  0x50   :  { %559 = vmatmul.mubr.bf16.vlgmr.msra.gmra.mxu0 %v47_v63  ;;  %1048 = vmatprep.subr.bf16.mxu1 %v1186_v41 }
  0x51   :  { %1064 = vmatprep.mubr.msk.bf16.mxu0 %vm1187_vm0, %v1186_v41  ;;  %1057 = vmatpush3.bf16.msra.mxu0 %v1131_v1 }
  0x52   :  { %1058 = vmatprep.subr.bf16.mxu0 %v1186_v41 }
  0x53   :  { %1049 = vmatpush3.bf16.msra.mxu1 %v1129_v6 }
  0x54   :  { %1050 = vmatprep.subr.bf16.mxu1 %v1186_v41 }
  0x55   :  { %1059 = vmatpush3.bf16.msra.mxu0 %v1132_v2 }
  0x56   :  { %1060 = vmatprep.subr.bf16.mxu0 %v1186_v41 }
  0x57   :  { %1051 = vmatpush3.bf16.msra.mxu1 %v1130_v7 }
  0x59   :  { %1061 = vmatpush3.bf16.msra.mxu0 %v1133_v3 }
  0x5a   :  { %1062 = vmatprep.subr.bf16.mxu0 %v1186_v41 }
  0x5d   :  { %1063 = vmatpush3.bf16.msra.mxu0 %v1134_v4 }
  0xf0   :  { %v964_v8 = vpop.f32.mrf.mxu0 }
  0xf1   :  { %v986_v9 = vpop.f32.mrf.mxu1 }
  0xf2   :  { %v965_v10 = vpop.f32.mrf.mxu0 }
  0xf3   :  { %v987_v11 = vpop.f32.mrf.mxu1  ;;  %v966_v20 = vadd.f32 %v965_v10, %v964_v8 }
  0xf4   :  { %v967_v12 = vpop.f32.mrf.mxu0  ;;  %v988_v21 = vadd.f32 %v987_v11, %v986_v9 }
  0xf5   :  { %v989_v13 = vpop.f32.mrf.mxu1 }
  0xf6   :  { %v968_v14 = vpop.f32.mrf.mxu0  ;;  %v521_v24 = vadd.f32 %v988_v21, %v966_v20 }
  0xf7   :  { %v990_v15 = vpop.f32.mrf.mxu1 }
  0xf9   :  { %v600_v16 = vpop.f32.mrf.mxu1 }
  0xfb   :  { %v1034_v17 = vpop.f32.mrf.mxu1 }
  0xfd   :  { %v603_v18 = vpop.f32.mrf.mxu1 }
  0xff   :  { %v1035_v19 = vpop.f32.mrf.mxu1 }
 0x110   :  { %v1008_v22 = vpop.f32.mrf.mxu0 }
 0x112   :  { %v1009_v23 = vpop.f32.mrf.mxu0 }
 0x113   :  { %v1010_v25 = vadd.f32 %v1009_v23, %v1008_v22 }
 0x114   :  { %v1011_v26 = vpop.f32.mrf.mxu0 }
 0x115   :  { %v561_v27 = vadd.f32 %v1010_v25, %v521_v24 }
 0x116   :  { %v1012_v28 = vpop.f32.mrf.mxu0 }
 0x117   :  { %v601_v29 = vadd.f32 %v600_v16, %v561_v27 }
 0x119   :  { %v608_v30 = vrot.slane %v601_v29, 4  ;;  %v616_v31 = vmul.f32 %v601_v29, %v601_v29 }
 0x11b   :  { %v609_v32 = vadd.f32 %v608_v30, %v601_v29  ;;  %v617_v33 = vrot.slane %v616_v31, 4 }
 0x11d   :  { %v610_v34 = vrot.slane %v609_v32, 2  ;;  %v618_v35 = vadd.f32 %v617_v33, %v616_v31 }
 0x11f   :  { %v611_v36 = vadd.f32 %v610_v34, %v609_v32  ;;  %v619_v37 = vrot.slane %v618_v35, 2  ;;  %v749_v32 = vld [vmem:[%s1323_s4 + $0x3] sm:$0x1] }
 0x121   :  { %v612_v38 = vrot.slane %v611_v36, 1  ;;  %v620_v39 = vadd.f32 %v619_v37, %v618_v35 }
 0x123   :  { %v613_v40 = vadd.f32 %v612_v38, %v611_v36  ;;  %v621_v42 = vrot.slane %v620_v39, 1 }
 0x125   :  { %v622_v43 = vadd.f32 %v621_v42, %v620_v39  ;;  %v615_v44 = vmul.f32 0.125, %v613_v40  ;;  %v942_v42 = vld [vmem:[%s1323_s4 + $0x4] ss:$0 sm:$0xff] }
 0x127   :  { %v623_v45 = vmul.f32 0.125, %v622_v43  ;;  %v624_v46 = vmul.f32 %v615_v44, %v615_v44 }
 0x129   :  { %v625_v47 = vsub.f32 %v623_v45, %v624_v46 }
 0x12b   :  { %v626_v48 = vmax.f32 %v625_v47, 0.0 }
 0x12d   :  { %v627_v49 = vadd.f32 1e-05, %v626_v48 }
 0x12f   :  { %1135 = vrsqrt.f32 %v627_v49 }
 0x13c   :  { %v1136_v54 = vpop.eup %1135 }
 0x13d   :  { %v629_v55 = vmul.f32 %v1136_v54, %v606_v52 }
 0x13f   :  { %v630_v57 = vmul.f32 %v629_v55, %v615_v44  ;;  %v635_v58 = vrot.slane %v629_v55, %v634_v53 }
 0x141   :  { %v631_v59 = vsub.f32 %v607_v56, %v630_v57  ;;  %v636_v60 = vmul.f32 %v635_v58, %v601_v29  ;;  %v748_v29 = vld [vmem:[%s1323_s4 + $0x2] sm:$0x1] }
 0x143   :  { %v640_v61 = vrot.slane %v631_v59, %v634_v53 }
 0x145   :  { %v641_v62 = vadd.f32 %v640_v61, %v636_v60 }
 0x147   :  { %v642_v63 = vmax.f32 %v641_v62, 0.0 }
 0x149   :  { %v643_v0 = vpack.c.bf16 %v642_v63, %v642_v63 }
 0x14b   :  { %1053 = vmatmul.mubr.bf16.vlgmr.msra.gmra.mxu1 %v643_v0 }
 0x20b   :  { %v742_v5 = vpop.f32.mrf.mxu1 }
 0x20c   :  { %v751_v6 = vsel %vm750_vm2, %v742_v5, 0.0  ;;  %v759_v7 = vmul.f32 %v742_v5, %v742_v5 }
 0x20d   :  { %v752_v8 = vrot.slane %v751_v6, 4  ;;  %v1054_v9 = vpop.f32.mrf.mxu1 }
 0x20e   :  { %v760_v10 = vsel %vm750_vm2, %v759_v7, 0.0 }
 0x20f   :  { %v753_v11 = vadd.f32 %v752_v8, %v751_v6  ;;  %v761_v12 = vrot.slane %v760_v10, 4  ;;  %v745_v13 = vpop.f32.mrf.mxu1 }
 0x211   :  { %v754_v14 = vrot.slane %v753_v11, 2  ;;  %v762_v15 = vadd.f32 %v761_v12, %v760_v10  ;;  %v1055_v41 = vpop.f32.mrf.mxu1 }
 0x213   :  { %v755_v16 = vadd.f32 %v754_v14, %v753_v11  ;;  %v763_v17 = vrot.slane %v762_v15, 2 }
 0x215   :  { %v756_v18 = vrot.slane %v755_v16, 1  ;;  %v764_v19 = vadd.f32 %v763_v17, %v762_v15 }
 0x217   :  { %v757_v20 = vadd.f32 %v756_v18, %v755_v16  ;;  %v765_v21 = vrot.slane %v764_v19, 1 }
 0x219   :  { %v758_v22 = vmul.f32 0.125, %v757_v20  ;;  %v766_v23 = vadd.f32 %v765_v21, %v764_v19 }
 0x21b   :  { %v767_v24 = vmul.f32 0.125, %v766_v23  ;;  %v768_v25 = vmul.f32 %v758_v22, %v758_v22 }
 0x21d   :  { %v769_v26 = vsub.f32 %v767_v24, %v768_v25 }
 0x21f   :  { %v770_v27 = vmax.f32 %v769_v26, 0.0 }
 0x221   :  { %v771_v28 = vadd.f32 1e-05, %v770_v27 }
 0x223   :  { %1137 = vrsqrt.f32 %v771_v28 }
 0x230   :  { %v1138_v30 = vpop.eup %1137 }
 0x231   :  { %v773_v31 = vmul.f32 %v1138_v30, %v748_v29 }
 0x233   :  { %v774_v33 = vmul.f32 %v773_v31, %v758_v22  ;;  %v779_v34 = vrot.slane %v773_v31, %v634_v53 }
 0x235   :  { %v775_v35 = vsub.f32 %v749_v32, %v774_v33  ;;  %v780_v36 = vmul.f32 %v779_v34, %v742_v5 }
 0x237   :  { %v784_v37 = vrot.slane %v775_v35, %v634_v53 }
 0x239   :  { %v785_v38 = vadd.f32 %v784_v37, %v780_v36 }
 0x23b   :  { %v786_v39 = vmax.f32 %v785_v38, 0.0 }
 0x23d   :  { %v787_v40 = vpack.c.bf16 %v786_v39, %v786_v39 }
 0x23f   :  { %1065 = vmatmul.mubr.msk.bf16.vlgmr.msra.gmra.mxu0 %vm750_vm2, %v787_v40 }
 0x2ff   :  { %v862_v43 = vpop.f32.mrf.mxu0 }
 0x300   :  { %v863_v44 = vadd.f32 %v942_v42, %v862_v43 }
 0x301   :  { %v1066_v45 = vpop.f32.mrf.mxu0 }
 0x302   :  { %868 = vst [vmem:[#allocation5] sm:$0xff] %v863_v44 }
 0x303   :  { %v865_v46 = vpop.f32.mrf.mxu0 }
 0x304   :  { %1170 = shalt.err (!%p1167_p9)
}
 0x305   :  { %878 = dma.vmem_to_hbm [thread:$0]  %s876_s18, 128, %s1324_s5, [#allocation4]   ;;  %v1067_v47 = vpop.f32.mrf.mxu0 }
 0x306   :  { %1181 = dma.done.wait [#allocation4], 128  }
 0x307   :  { %1182 = vsyncadd [#allocation4], 4294967168 }
 0x308   :  { %882 = vsyncpa [#allocation3], 1 }
 0x309   :  { %883 = vsyncpa [#allocation4], 1 }

</bundles_post_ra>
